<compile_context>
chip_gen: v7x
topology: tpu7x:2x2x1
jax: 0.10.0
libtpu: 0.0.40
codegen_flags: <defaults>
</compile_context>

<pallas_src>
import functools

import jax
import jax.numpy as jnp
from jax.experimental import pallas as pl
from jax.experimental.pallas import tpu as pltpu


def _sum_all(v):
    """Full reduction of a 2-D tile kept as a (1, 1) result (safe Mosaic pattern)."""
    return jnp.sum(jnp.sum(v, axis=1, keepdims=True), axis=0, keepdims=True)


def _coxph_kernel(risk_ref, cens_ref, loss_ref):
    c = cens_ref[...]          # (R, C) f32: censors, zero-padded tail
    # Event count up front (cheap VPU work; keeps the tail of the kernel lean).
    n_events = _sum_all((c != 0.0).astype(jnp.float32))          # (1, 1)

    x = risk_ref[...]          # (R, C) f32: batch flattened row-major, zero-padded tail
    R, C = x.shape

    # --- L2 normalization over the whole batch (eps = 1e-12, as in F.normalize) ---
    norm = jnp.sqrt(_sum_all(x * x))                              # (1, 1)
    inv_norm = pl.reciprocal(jnp.maximum(norm, 1e-12))            # exact (approx=False)
    riskmax = x * inv_norm                                        # |riskmax| <= 1

    # --- exp; safe without a max-shift because |riskmax| <= 1 after normalization ---
    e = jnp.exp(riskmax)
    # bf16-exact high part (kept in bf16) + bf16 residual: exactly 2 MXU passes with f32
    # accumulation, ~f32-accurate prefix sums.
    e_hi = e.astype(jnp.bfloat16)                                 # (R, C) bf16
    e_lo = (e - e_hi.astype(jnp.float32)).astype(jnp.bfloat16)    # (R, C) bf16

    # --- within-chunk inclusive prefix sum: (R, C) @ upper-triangular ones (C, C) ---
    ki = jax.lax.broadcasted_iota(jnp.int32, (C, C), 0)
    kj = jax.lax.broadcasted_iota(jnp.int32, (C, C), 1)
    triu = (ki <= kj).astype(jnp.bfloat16)                        # T[k, j] = 1 iff k <= j
    row_cum = (jnp.dot(e_hi, triu, preferred_element_type=jnp.float32)
               + jnp.dot(e_lo, triu, preferred_element_type=jnp.float32))   # (R, C) f32

    if R > 1:
        # --- reduce-first exclusive carry: per-row totals are the LAST column of the
        #     inclusive per-chunk prefix sum (hi+lo already folded, f32) ---
        row_tot = row_cum[:, C - 1:C]                             # (R, 1) f32
        ri = jax.lax.broadcasted_iota(jnp.int32, (R, R), 0)
        rj = jax.lax.broadcasted_iota(jnp.int32, (R, R), 1)
        strict_l = (rj < ri).astype(jnp.float32)                  # L[r, r'] = 1 iff r' < r
        carry = jnp.dot(strict_l, row_tot,
                        preferred_element_type=jnp.float32)       # (R, 1): sum of prev rows
        cum = row_cum + carry                                     # flat inclusive cumsum
    else:
        cum = row_cum

    # Padded tail slots pick up extra exp(0)=1 terms in `cum`, but they sit strictly
    # AFTER every real sample, keep log() finite, and are dropped by censor == 0.
    total = _sum_all((riskmax - jnp.log(cum)) * c)                # (1, 1)
    # NaN/inf if there are no events -- same behavior as the PyTorch reference.
    loss_ref[...] = -total / n_events


def _pick_chunk():
    """256-wide chunks for v6e/v7x (256x256 MXU); 128 for v5e / older / unknown."""
    try:
        kind = jax.devices()[0].device_kind.lower()
    except Exception:
        return 128
    if any(tag in kind for tag in ("v6", "v7", "tpu7", "7x")):
        return 256
    return 128


@functools.partial(jax.jit, static_argnames=("chunk",))
def _coxph_call(risk_flat, cens_flat, *, chunk):
    n = risk_flat.shape[0]
    n_pad = ((n + chunk - 1) // chunk) * chunk
    pad = n_pad - n
    rows = n_pad // chunk
    # Zero padding is neutral: it adds nothing to the L2 norm, its exp() only lands in
    # cumsum slots past the last real sample, and censor == 0 removes it from both sums.
    r2 = jnp.pad(risk_flat, (0, pad)).reshape(rows, chunk)
    c2 = jnp.pad(cens_flat, (0, pad)).reshape(rows, chunk)

    # Footprint-based scoped-VMEM limit: 2 inputs + ~10 live (R, C) f32/bf16 temporaries
    # + (C, C) bf16 triangular constant + (R, R) f32 carry mask, with slack.  Capped at
    # 48 MiB to keep headroom under v7x's 64 MiB physical VMEM (v5e/v6e have 128 MiB).
    est = 12 * rows * chunk * 4 + 2 * chunk * chunk + 4 * rows * rows + (4 << 20)
    vmem_limit = int(min(max(est, 32 << 20), 48 << 20))

    out = pl.pallas_call(
        _coxph_kernel,
        out_shape=jax.ShapeDtypeStruct((1, 1), jnp.float32),
        in_specs=[pl.BlockSpec(memory_space=pltpu.MemorySpace.VMEM),
                  pl.BlockSpec(memory_space=pltpu.MemorySpace.VMEM)],
        out_specs=pl.BlockSpec(memory_space=pltpu.MemorySpace.VMEM),
        compiler_params=pltpu.CompilerParams(vmem_limit_bytes=vmem_limit),
    )(r2, c2)
    return out[0, 0]


def coxph_loss(risk, censors, chunk=None):
    """risk: (N,) or (N, 1); censors: (N,) or (N, 1). Returns scalar f32 loss."""
    r = jnp.asarray(risk, jnp.float32).reshape(-1)
    c = jnp.asarray(censors, jnp.float32).reshape(-1)
    if chunk is None:
        chunk = _pick_chunk()
    # TODO(synk): for batches far too large for the single-shot VMEM footprint (~millions
    # of samples, especially on v7x's 64 MiB VMEM), switch to a two-pass gridded variant:
    # pass 1 reduces the global L2 norm; pass 2 tiles R on an "arbitrary" grid axis with a
    # running exp-sum carry in scratch, accumulating the loss numerator/denominator.
    return _coxph_call(r, c, chunk=int(chunk))


def _coxph_ref(risk, censors):
    """Pure-JAX reference mirroring the PyTorch module."""
    r = jnp.asarray(risk, jnp.float32).reshape(-1, 1)
    c = jnp.asarray(censors, jnp.float32).reshape(-1, 1)
    norm = jnp.sqrt(jnp.sum(r * r))
    riskmax = r / jnp.maximum(norm, 1e-12)
    log_risk = jnp.log(jnp.cumsum(jnp.exp(riskmax), axis=0))
    unc = riskmax - log_risk
    return -jnp.sum(unc * c) / jnp.sum(c != 0).astype(jnp.float32)


if __name__ == "__main__":
    key = jax.random.PRNGKey(0)
    k1, k2, k3, k4, k5, k6 = jax.random.split(key, 6)

    # Test 1: small batch (typical CoxPH mini-batch), single chunk (R == 1, no carry).
    N1 = 8
    risk1 = jax.random.normal(k1, (N1, 1), dtype=jnp.float32)
    cens1 = (jax.random.uniform(k2, (N1,)) > 0.4).astype(jnp.float32)
    cens1 = cens1.at[0].set(1.0)                     # guarantee at least one event
    loss1 = jax.block_until_ready(coxph_loss(risk1, cens1))
    ref1 = _coxph_ref(risk1, cens1)
    assert jnp.allclose(loss1, ref1, rtol=1e-4, atol=1e-4), (loss1, ref1)

    # Test 2: batch spanning several chunks with a padded tail (exercises the
    # reduce-first cross-chunk carry path).
    N2 = 300
    risk2 = jax.random.normal(k3, (N2, 1), dtype=jnp.float32)
    cens2 = (jax.random.uniform(k4, (N2,)) > 0.5).astype(jnp.float32)
    cens2 = cens2.at[0].set(1.0)
    loss2 = jax.block_until_ready(coxph_loss(risk2, cens2))
    ref2 = _coxph_ref(risk2, cens2)
    assert jnp.allclose(loss2, ref2, rtol=1e-4, atol=1e-4), (loss2, ref2)

    # Test 3: larger batch (more carry rows, exact multiple of 128 and not of 256*4).
    N3 = 1000
    risk3 = jax.random.normal(k5, (N3, 1), dtype=jnp.float32)
    cens3 = (jax.random.uniform(k6, (N3,)) > 0.5).astype(jnp.float32)
    cens3 = cens3.at[0].set(1.0)
    loss3 = jax.block_until_ready(coxph_loss(risk3, cens3))
    ref3 = _coxph_ref(risk3, cens3)
    assert jnp.allclose(loss3, ref3, rtol=1e-4, atol=1e-4), (loss3, ref3)

    print("KERNEL_OK")
</pallas_src>

<mosaic_0001>
module attributes {stable_mosaic.version = 11 : i64} {
  func.func @_coxph_kernel(%arg0: memref<1x128xf32, #tpu.memory_space<vmem>>, %arg1: memref<1x128xf32, #tpu.memory_space<vmem>>, %arg2: memref<1x1xf32, #tpu.memory_space<vmem>>) attributes {dimension_semantics = [], scalar_prefetch = 0 : i64, scratch_operands = 0 : i64, tpu.core_type = #tpu.core_type<tc>} {
    %c0 = arith.constant 0 : index
    %c0_0 = arith.constant 0 : index
    %0 = vector.load %arg1[%c0, %c0_0] : memref<1x128xf32, #tpu.memory_space<vmem>>, vector<1x128xf32>
    %cst = arith.constant 0.000000e+00 : f32
    %1 = vector.broadcast %cst : f32 to vector<1x128xf32>
    %2 = arith.cmpf one, %0, %1 : vector<1x128xf32>
    %3 = arith.extui %2 : vector<1x128xi1> to vector<1x128xi32>
    %4 = arith.sitofp %3 : vector<1x128xi32> to vector<1x128xf32>
    %cst_1 = arith.constant dense<0.000000e+00> : vector<1xf32>
    %5 = vector.multi_reduction <add>, %4, %cst_1 [1] : vector<1x128xf32> to vector<1xf32>
    %6 = vector.shape_cast %5 : vector<1xf32> to vector<1x1xf32>
    %cst_2 = arith.constant dense<0.000000e+00> : vector<1xf32>
    %7 = vector.multi_reduction <add>, %6, %cst_2 [0] : vector<1x1xf32> to vector<1xf32>
    %8 = vector.shape_cast %7 : vector<1xf32> to vector<1x1xf32>
    %c0_3 = arith.constant 0 : index
    %c0_4 = arith.constant 0 : index
    %9 = vector.load %arg0[%c0_3, %c0_4] : memref<1x128xf32, #tpu.memory_space<vmem>>, vector<1x128xf32>
    %10 = arith.mulf %9, %9 : vector<1x128xf32>
    %cst_5 = arith.constant dense<0.000000e+00> : vector<1xf32>
    %11 = vector.multi_reduction <add>, %10, %cst_5 [1] : vector<1x128xf32> to vector<1xf32>
    %12 = vector.shape_cast %11 : vector<1xf32> to vector<1x1xf32>
    %cst_6 = arith.constant dense<0.000000e+00> : vector<1xf32>
    %13 = vector.multi_reduction <add>, %12, %cst_6 [0] : vector<1x1xf32> to vector<1xf32>
    %14 = vector.shape_cast %13 : vector<1xf32> to vector<1x1xf32>
    %15 = math.sqrt %14 : vector<1x1xf32>
    %cst_7 = arith.constant 9.99999996E-13 : f32
    %16 = vector.broadcast %cst_7 : f32 to vector<1x1xf32>
    %17 = arith.maximumf %15, %16 : vector<1x1xf32>
    %18 = tpu.reciprocal %17 : vector<1x1xf32> -> vector<1x1xf32>
    %19 = vector.broadcast %18 : vector<1x1xf32> to vector<1x128xf32>
    %20 = arith.mulf %9, %19 : vector<1x128xf32>
    %21 = math.exp %20 : vector<1x128xf32>
    %22 = arith.truncf %21 : vector<1x128xf32> to vector<1x128xbf16>
    %23 = arith.extf %22 : vector<1x128xbf16> to vector<1x128xf32>
    %24 = arith.subf %21, %23 : vector<1x128xf32>
    %25 = arith.truncf %24 : vector<1x128xf32> to vector<1x128xbf16>
    %26 = tpu.iota {dimensions = array<i32: 0>} : vector<128x128xi32>
    %27 = tpu.iota {dimensions = array<i32: 1>} : vector<128x128xi32>
    %28 = arith.cmpi sle, %26, %27 : vector<128x128xi32>
    %29 = arith.extui %28 : vector<128x128xi1> to vector<128x128xi32>
    %30 = arith.sitofp %29 : vector<128x128xi32> to vector<128x128xf32>
    %31 = arith.truncf %30 : vector<128x128xf32> to vector<128x128xbf16>
    %cst_8 = arith.constant dense<0.000000e+00> : vector<1x128xf32>
    %32 = tpu.matmul %22, %31, %cst_8 {dimension_numbers = #tpu.dot_dimension_numbers<[1], [0], [0], [1], [0, 0, 1, 1], [], []>} : vector<1x128xbf16>, vector<128x128xbf16>, vector<1x128xf32> -> vector<1x128xf32>
    %cst_9 = arith.constant dense<0.000000e+00> : vector<1x128xf32>
    %33 = tpu.matmul %25, %31, %cst_9 {dimension_numbers = #tpu.dot_dimension_numbers<[1], [0], [0], [1], [0, 0, 1, 1], [], []>} : vector<1x128xbf16>, vector<128x128xbf16>, vector<1x128xf32> -> vector<1x128xf32>
    %34 = arith.addf %32, %33 : vector<1x128xf32>
    %35 = math.log %34 : vector<1x128xf32>
    %36 = arith.subf %20, %35 : vector<1x128xf32>
    %37 = arith.mulf %36, %0 : vector<1x128xf32>
    %cst_10 = arith.constant dense<0.000000e+00> : vector<1xf32>
    %38 = vector.multi_reduction <add>, %37, %cst_10 [1] : vector<1x128xf32> to vector<1xf32>
    %39 = vector.shape_cast %38 : vector<1xf32> to vector<1x1xf32>
    %cst_11 = arith.constant dense<0.000000e+00> : vector<1xf32>
    %40 = vector.multi_reduction <add>, %39, %cst_11 [0] : vector<1x1xf32> to vector<1xf32>
    %41 = vector.shape_cast %40 : vector<1xf32> to vector<1x1xf32>
    %cst_12 = arith.constant 0.000000e+00 : f32
    %42 = vector.broadcast %cst_12 : f32 to vector<1x1xf32>
    %43 = arith.subf %42, %41 : vector<1x1xf32>
    %44 = arith.divf %43, %8 : vector<1x1xf32>
    %c0_13 = arith.constant 0 : index
    %c0_14 = arith.constant 0 : index
    %45 = vector.load %arg2[%c0_13, %c0_14] : memref<1x1xf32, #tpu.memory_space<vmem>>, vector<1x1xf32>
    tpu.vector_store %arg2[%c0_13, %c0_14], %44 {strides = array<i32>} : memref<1x1xf32, #tpu.memory_space<vmem>>, vector<1x1xf32>,
    return
  }
}

</mosaic_0001>

<bundles_post_ra>
// kernel: _coxph_call.1
= control target key start
LH: loop header
LB: loop body
LE: loop exit
PB: predicated region body
PF: predicated region fallthrough
CT: control target
= control target key end

     0   :  { %vm17_vm0 = vcmask 1040384   ;;  %s470_s0 = inlined_call_operand.vmem [shape: f32[1,128], index: 0, kind: input, shape index: {}]   ;;  %s471_s1 = inlined_call_operand.vmem [shape: f32[1,128], index: 1, kind: input, shape index: {}]   ;;  %s472_s2 = inlined_call_operand.hbm [shape: f32[1,1], index: 2, kind: output, shape index: {}]  }
   0x1   :  { %v394_v0 = vld [vmem:[%s470_s0] sm:$0x1] }
   0x2   :  { %7 = vsyncpa [#allocation3], 0  ;;  %v23_v1 = vmul.f32 %v394_v0, %v394_v0  ;;  %v44_v3 = vlaneseq  ;;  %v372_v7 = vmov 0.0   ;;  %v373_v8 = vmov 1.0|1.0  }
   0x3   :  { %313 = vmatprep.subr.bf16.mxu0 %v372_v7  ;;  %293 = vmatprep.subr.bf16.mxu1 %v372_v7  ;;  %vm374_vm15 = vmmov 0   ;;  %v13_v38 = vld [vmem:[%s471_s1] sm:$0x1]  ;;  %s375_s1 = smov [#allocation2]  }
   0x4   :  { %v24_v2 = vsel %vm17_vm0, %v23_v1, 0.0  ;;  %v45_v4 = vshrl.u32 %v44_v3, 7  ;;  %v399_v6 = vand.u32 127, %v44_v3  ;;  %329 = vmatprep.mubr.msk.bf16.mxu0 %vm374_vm15, %v372_v7  ;;  %309 = vmatprep.mubr.msk.bf16.mxu1 %vm374_vm15, %v372_v7  ;;  %s218_s12 = sshll.u32 %s375_s1, 4  ;;  %s219_s12 = int_to_ptr.vmem [resolvable:$true] %s218_s12 }
   0x5   :  { %25 = vadd.xlane.f32.xlu0 %v24_v2  ;;  %s348_s13 = scalar_lea.vmem %s219_s12, 16  ;;  %s352_s14 = scalar_lea.vmem %s219_s12, 32 }
   0x6   :  { %v46_v5 = vadd.s32 8, %v45_v4  ;;  %vm63_vm1 = vcmp.le.s32.totalorder %v45_v4, %v399_v6  ;;  %v47_v9 = vadd.s32 16, %v45_v4  ;;  %v48_v10 = vadd.s32 24, %v45_v4  ;;  %p349_p0 = scmp.ne.s32.totalorder %s219_s12, %s348_s13  ;;  %p353_p1 = scmp.lt.s32.totalorder %s219_s12, %s219_s12 }
   0x7   :  { %v49_v11 = vadd.s32 32, %v45_v4  ;;  %v50_v12 = vadd.s32 40, %v45_v4  ;;  %v51_v13 = vadd.s32 48, %v45_v4  ;;  %v52_v14 = vadd.s32 56, %v45_v4  ;;  %p354_p2 = scmp.lt.s32.totalorder %s352_s14, %s348_s13 }
   0x8   :  { %vm64_vm2 = vcmp.le.s32.totalorder %v46_v5, %v399_v6  ;;  %vm65_vm4 = vcmp.le.s32.totalorder %v47_v9, %v399_v6  ;;  %vm66_vm5 = vcmp.le.s32.totalorder %v48_v10, %v399_v6  ;;  %v53_v15 = vadd.s32 64, %v45_v4 }
   0x9   :  { %vm243_vm3 = vmpackc.low %vm64_vm2, %vm63_vm1  ;;  %vm67_vm7 = vcmp.le.s32.totalorder %v49_v11, %v399_v6  ;;  %vm68_vm8 = vcmp.le.s32.totalorder %v50_v12, %v399_v6  ;;  %vm69_vm10 = vcmp.le.s32.totalorder %v51_v13, %v399_v6  ;;  %vm70_vm11 = vcmp.le.s32.totalorder %v52_v14, %v399_v6  ;;  %p355_p3 = por %p354_p2, %p353_p1 }
   0xa   :  { %314 = vmatpush3.bf16.msk.msra.mxu0 %vm243_vm3, %v373_v8  ;;  %294 = vmatpush3.bf16.msk.msra.mxu1 %vm243_vm3, %v373_v8  ;;  %vm245_vm6 = vmpackc.low %vm66_vm5, %vm65_vm4  ;;  %v54_v16 = vadd.s32 72, %v45_v4  ;;  %vm71_vm13 = vcmp.le.s32.totalorder %v53_v15, %v399_v6  ;;  %v55_v17 = vadd.s32 80, %v45_v4  ;;  %v56_v18 = vadd.s32 88, %v45_v4 }
   0xb   :  { %315 = vmatprep.subr.bf16.mxu0 %v372_v7  ;;  %295 = vmatprep.subr.bf16.mxu1 %v372_v7  ;;  %vm247_vm9 = vmpackc.low %vm68_vm8, %vm67_vm7  ;;  %v57_v19 = vadd.s32 96, %v45_v4  ;;  %v58_v20 = vadd.s32 104, %v45_v4  ;;  %v59_v21 = vadd.s32 112, %v45_v4  ;;  %v60_v22 = vadd.s32 120, %v45_v4  ;;  %p356_p4 = pnand %p355_p3, %p349_p0 }
   0xc   :  { %vm249_vm12 = vmpackc.low %vm70_vm11, %vm69_vm10  ;;  %vm72_vm14 = vcmp.le.s32.totalorder %v54_v16, %v399_v6  ;;  %vm73_vm2 = vcmp.le.s32.totalorder %v55_v17, %v399_v6  ;;  %vm74_vm3 = vcmp.le.s32.totalorder %v56_v18, %v399_v6 }
   0xd   :  { %vm251_vm1 = vmpackc.low %vm72_vm14, %vm71_vm13  ;;  %vm75_vm5 = vcmp.le.s32.totalorder %v57_v19, %v399_v6  ;;  %vm77_vm8 = vcmp.le.s32.totalorder %v59_v21, %v399_v6  ;;  %vm14_vm13 = vcmp.ne.f32.partialorder %v13_v38, 0.0  ;;  %vm210_vm14 = vcmask 0  }
   0xe   :  { %316 = vmatpush3.bf16.msk.msra.mxu0 %vm245_vm6, %v373_v8  ;;  %296 = vmatpush3.bf16.msk.msra.mxu1 %vm245_vm6, %v373_v8  ;;  %vm253_vm4 = vmpackc.low %vm74_vm3, %vm73_vm2  ;;  %vm76_vm6 = vcmp.le.s32.totalorder %v58_v20, %v399_v6  ;;  %v226_v39 = vsel %vm14_vm13, 1.0, %v372_v7 }
   0xf   :  { %317 = vmatprep.subr.bf16.mxu0 %v372_v7  ;;  %297 = vmatprep.subr.bf16.mxu1 %v372_v7  ;;  %vm255_vm7 = vmpackc.low %vm76_vm6, %vm75_vm5  ;;  %v18_v40 = vsel %vm17_vm0, %v226_v39, 0.0 }
  0x10   :  { %19 = vadd.xlane.f32.xlu0 %v18_v40 }
  0x12   :  { %318 = vmatpush3.bf16.msk.msra.mxu0 %vm247_vm9, %v373_v8  ;;  %298 = vmatpush3.bf16.msk.msra.mxu1 %vm247_vm9, %v373_v8  ;;  %vm78_vm9 = vcmp.le.s32.totalorder %v60_v22, %v399_v6 }
  0x13   :  { %319 = vmatprep.subr.bf16.mxu0 %v372_v7  ;;  %299 = vmatprep.subr.bf16.mxu1 %v372_v7  ;;  %vm257_vm10 = vmpackc.low %vm78_vm9, %vm77_vm8 }
  0x16   :  { %320 = vmatpush3.bf16.msk.msra.mxu0 %vm249_vm12, %v373_v8  ;;  %300 = vmatpush3.bf16.msk.msra.mxu1 %vm249_vm12, %v373_v8 }
  0x17   :  { %321 = vmatprep.subr.bf16.mxu0 %v372_v7  ;;  %301 = vmatprep.subr.bf16.mxu1 %v372_v7 }
  0x1a   :  { %322 = vmatpush3.bf16.msk.msra.mxu0 %vm251_vm1, %v373_v8  ;;  %302 = vmatpush3.bf16.msk.msra.mxu1 %vm251_vm1, %v373_v8 }
  0x1b   :  { %323 = vmatprep.subr.bf16.mxu0 %v372_v7  ;;  %303 = vmatprep.subr.bf16.mxu1 %v372_v7 }
  0x1e   :  { %324 = vmatpush3.bf16.msk.msra.mxu0 %vm253_vm4, %v373_v8  ;;  %304 = vmatpush3.bf16.msk.msra.mxu1 %vm253_vm4, %v373_v8 }
  0x1f   :  { %325 = vmatprep.subr.bf16.mxu0 %v372_v7  ;;  %305 = vmatprep.subr.bf16.mxu1 %v372_v7 }
  0x22   :  { %326 = vmatpush3.bf16.msk.msra.mxu0 %vm255_vm7, %v373_v8  ;;  %306 = vmatpush3.bf16.msk.msra.mxu1 %vm255_vm7, %v373_v8 }
  0x23   :  { %327 = vmatprep.subr.bf16.mxu0 %v372_v7  ;;  %307 = vmatprep.subr.bf16.mxu1 %v372_v7 }
  0x26   :  { %328 = vmatpush3.bf16.msk.msra.mxu0 %vm257_vm10, %v373_v8  ;;  %308 = vmatpush3.bf16.msk.msra.mxu1 %vm257_vm10, %v373_v8 }
  0x92   :  { %v26_v23 = vpop.xlane.xlu0 %25 }
  0x93   :  { %338 = vrsqrt.f32 %v26_v23  ;;  %vm30_vm11 = vcmp.eq.f32.partialorder %v26_v23, inf  ;;  %v33_v26 = vand.u32 2147483648, %v26_v23  ;;  %vm32_vm12 = vcmp.eq.f32.partialorder %v26_v23, 0.0 }
  0x9d   :  { %v339_v24 = vpop.eup %338  ;;  %v20_v55 = vpop.xlane.xlu0 %19 }
  0x9e   :  { %v29_v25 = vmul.f32 %v339_v24, %v26_v23 }
  0xa0   :  { %v31_v27 = vsel %vm30_vm11, %v26_v23, %v29_v25 }
  0xa1   :  { %v34_v28 = vsel %vm32_vm12, %v33_v26, %v31_v27 }
  0xa2   :  { %v35_v29 = vmax.f32 %v34_v28, 1e-12 }
  0xa4   :  { %340 = vrcp.f32 %v35_v29 }
  0xae   :  { %v341_v30 = vpop.eup %340 }
  0xaf   :  { %v37_v31 = vmul.f32 %v341_v30, %v394_v0 }
  0xb1   :  { %v38_v32 = vmul.f32 1.442695, %v37_v31 }
  0xb3   :  { %342 = vpow2.f32 %v38_v32 }
  0xbd   :  { %v343_v33 = vpop.eup %342 }
  0xbe   :  { %v40_v34 = vpack.c.bf16 %v343_v33, %v343_v33 }
  0xc0   :  { %v41_v35 = vunpack.c.l.bf16 %v40_v34  ;;  %330 = vmatmul.mubr.bf16.vlgmr.msra.gmra.mrb[0].mxu0 %v40_v34 }
  0xc2   :  { %v42_v36 = vsub.f32 %v343_v33, %v41_v35 }
  0xc4   :  { %v43_v37 = vpack.c.bf16 %v42_v36, %v42_v36 }
  0xc6   :  { %310 = vmatmul.mubr.bf16.vlgmr.msra.gmra.mrb[0].mxu1 %v43_v37 }
 0x193   :  { %v193_v41 = vpop.f32.mrb[0].mxu0 }
 0x194   :  { %v331_v42 = vpop.f32.mrb[1].mxu0 }
 0x195   :  { %v196_v43 = vpop.f32.mrb[2].mxu0 }
 0x196   :  { %v332_v44 = vpop.f32.mrb[3].mxu0 }
 0x199   :  { %v153_v45 = vpop.f32.mrb[0].mxu1 }
 0x19a   :  { %v194_v46 = vadd.f32 %v193_v41, %v153_v45  ;;  %v311_v47 = vpop.f32.mrb[1].mxu1 }
 0x19b   :  { %v156_v48 = vpop.f32.mrb[2].mxu1 }
 0x19c   :  { %344 = vlog2.f32 %v194_v46  ;;  %v312_v49 = vpop.f32.mrb[3].mxu1 }
 0x19d   :  { %346 = vrcp.f32 %v20_v55 }
 0x1a6   :  { %v345_v50 = vpop.eup %344 }
 0x1a7   :  { %v200_v51 = vmul.f32 0.6931472, %v345_v50  ;;  %v347_v56 = vpop.eup %346 }
 0x1a9   :  { %v201_v52 = vsub.f32 %v37_v31, %v200_v51 }
 0x1ab   :  { %v202_v53 = vmul.f32 %v201_v52, %v13_v38 }
 0x1ad   :  { %v203_v54 = vsel %vm17_vm0, %v202_v53, 0.0 }
 0x1ae   :  { %204 = vadd.xlane.f32.xlu1 %v203_v54 }
 0x23b   :  { %v205_v57 = vpop.xlane.xlu1 %204 }
 0x23c   :  { %v207_v58 = vsub.f32 0.0, %v205_v57 }
 0x23e   :  { %v209_v59 = vmul.f32 %v347_v56, %v207_v58 }
 0x240   :  { %211 = vst.msk [vmem:[#allocation2] sm:$0x1] %vm210_vm14, %v209_v59 }
 0x241   :  { %359 = shalt.err (!%p356_p4)
}
 0x242   :  { %s360_s17 = scalar_lea.hbm %s472_s2, 16 }
 0x243   :  { %p361_p5 = scmp.ne.s32.totalorder %s472_s2, %s360_s17  ;;  %p364_p6 = scmp.lt.u32.totalorder %s360_s17, %s472_s2 }
 0x245   :  { %p366_p7 = pnand %p364_p6, %p361_p5 }
 0x247   :  { %369 = shalt.err (!%p366_p7)
}
 0x248   :  { %221 = dma.vmem_to_hbm [thread:$0]  %s219_s12, 16, %s472_s2, [#allocation3]  }
 0x249   :  { %370 = dma.done.wait [#allocation3], 16  }
 0x24a   :  { %371 = vsyncadd [#allocation3], 4294967280 }
 0x24b   :  { %225 = vsyncpa [#allocation3], 1 }

</bundles_post_ra>
